<compile_context>
chip_gen: v7x
topology: tpu7x:2x2x1
jax: 0.10.0
libtpu: 0.0.40
codegen_flags: <defaults>
</compile_context>

<pallas_src>
import functools

import numpy as np
import jax
import jax.numpy as jnp
from jax import lax
from jax.experimental import pallas as pl
from jax.experimental.pallas import tpu as pltpu


# ----------------------------------------------------------------------------
# Glue: rearranges mirroring local_sampling / F.unfold (pure data movement)
# ----------------------------------------------------------------------------
def local_group(x, gh, gw):
    # x: [B, H, W, C] -> [(B*numh*numw), gh*gw, C]   (einops local grouping)
    B, H, W, C = x.shape
    numh, numw = H // gh, W // gw
    x = x.reshape(B, numh, gh, numw, gw, C)
    x = x.transpose(0, 1, 3, 2, 4, 5)
    return x.reshape(B * numh * numw, gh * gw, C)


def unfold_nchw(x, kh, kw, ph, pw, sh, sw):
    # x: [B, C, H, W] -> [(B*L), kh*kw, C]   (F.unfold + einops rearrange)
    B, C, H, W = x.shape
    xp = jnp.pad(x, ((0, 0), (0, 0), (ph, ph), (pw, pw)))
    Lh = (H + 2 * ph - kh) // sh + 1
    Lw = (W + 2 * pw - kw) // sw + 1
    ih = (np.arange(Lh, dtype=np.int32)[:, None] * sh +
          np.arange(kh, dtype=np.int32)[None, :])            # [Lh, kh]
    iw = (np.arange(Lw, dtype=np.int32)[:, None] * sw +
          np.arange(kw, dtype=np.int32)[None, :])            # [Lw, kw]
    patches = xp[:, :, ih[:, :, None, None], iw[None, None, :, :]]  # [B,C,Lh,kh,Lw,kw]
    patches = patches.transpose(0, 2, 4, 3, 5, 1)                    # [B,Lh,Lw,kh,kw,C]
    return patches.reshape(B * Lh * Lw, kh * kw, C)


def unfold_to_heads(x_nhwc, kh, kw, ph, pw, sh, sw, num_heads, head_dim):
    # x_nhwc: [B, H, W, 2C] -> [B*L, 2, num_heads, head_dim, kh*kw]
    # Head-major layout the kernel wants (no in-kernel lane slicing for xs).
    B, Hh, Ww, C2 = x_nhwc.shape
    xp = jnp.pad(x_nhwc, ((0, 0), (ph, ph), (pw, pw), (0, 0)))
    Lh = (Hh + 2 * ph - kh) // sh + 1
    Lw = (Ww + 2 * pw - kw) // sw + 1
    ih = (np.arange(Lh, dtype=np.int32)[:, None] * sh +
          np.arange(kh, dtype=np.int32)[None, :])             # [Lh, kh]
    iw = (np.arange(Lw, dtype=np.int32)[:, None] * sw +
          np.arange(kw, dtype=np.int32)[None, :])             # [Lw, kw]
    patches = xp[:, ih[:, :, None, None], iw[None, None, :, :], :]   # [B,Lh,kh,Lw,kw,2C]
    patches = patches.transpose(0, 1, 3, 2, 4, 5)                     # [B,Lh,Lw,kh,kw,2C]
    patches = patches.reshape(B, Lh, Lw, kh, kw, 2, num_heads, head_dim)
    patches = patches.transpose(0, 1, 2, 5, 6, 7, 3, 4)               # [B,Lh,Lw,2,H,c,kh,kw]
    return patches.reshape(B * Lh * Lw, 2, num_heads, head_dim, kh * kw)


# ----------------------------------------------------------------------------
# Relative position tables (buffers, computed once in numpy)
# ----------------------------------------------------------------------------
def make_rel_coords_table(gh, gw, kh, kw):
    ch = np.arange(-(kh - 1), gh, dtype=np.float32)
    cw = np.arange(-(kw - 1), gw, dtype=np.float32)
    hh, ww = np.meshgrid(ch, cw, indexing='ij')
    table = np.stack([hh, ww], axis=-1)[None]        # [1, Th, Tw, 2]
    table[..., 0] /= (gh - 1)
    table[..., 1] /= (gw - 1)
    table *= 8.0
    table = np.sign(table) * np.log2(np.abs(table) + 1.0) / np.log2(8.0)
    return table.astype(np.float32)


def make_rel_pos_index(gh, gw, kh, kw):
    gy, gx = np.meshgrid(np.arange(gh), np.arange(gw), indexing='ij')
    grid = np.stack([gy, gx]).reshape(2, -1)          # [2, n]
    sy, sx = np.meshgrid(np.arange(kh), np.arange(kw), indexing='ij')
    samp = np.stack([sy, sx]).reshape(2, -1)          # [2, N]
    rel = samp[:, None, :] - grid[:, :, None]         # [2, n, N]
    rel = rel.transpose(1, 2, 0).astype(np.int64)     # [n, N, 2]
    rel[..., 0] += gh - kh + 1
    rel[..., 0] *= gw + kw - 1
    rel[..., 1] += gw - kw + 1
    idx = rel.sum(-1)                                 # [n, N]
    # emulate PyTorch's negative-index wrap-around into the flat table
    idx = np.mod(idx, (gh + kh - 1) * (gw + kw - 1))
    return idx.astype(np.int32)


def rel_pos_bias(params, table, index, num_heads):
    # cpb_mlp: Linear(2,512)+ReLU+Linear(512,H)  (tiny, kept in plain JAX glue)
    n, N = index.shape
    h = jnp.maximum(table.reshape(-1, 2) @ params['cpb_w1'] + params['cpb_b1'], 0.0)
    tbl = h @ params['cpb_w2']                                   # [Th*Tw, H]
    bias = tbl[index.reshape(-1)].reshape(n, N, num_heads).transpose(2, 0, 1)
    return 16.0 * jax.nn.sigmoid(bias)                           # [H, n, N]


# ----------------------------------------------------------------------------
# Pallas kernels
# ----------------------------------------------------------------------------
def _linear_kernel(x_ref, w_ref, b_ref, o_ref, *, use_bf16):
    mm = jnp.bfloat16 if use_bf16 else jnp.float32
    y = (jnp.dot(x_ref[...].astype(mm), w_ref[...].astype(mm),
                 preferred_element_type=jnp.float32) + b_ref[...])
    o_ref[...] = y.astype(o_ref.dtype)


def pallas_linear(x, w, b, *, block_rows=512, use_bf16=True):
    # Row-tiled dense layer (proj_sample): mem-bound, so use 512-row tiles and
    # emit bf16 output when bf16 streaming is enabled.
    M, K = x.shape
    _, Nc = w.shape
    bm = min(block_rows, M)
    out_dtype = jnp.bfloat16 if use_bf16 else x.dtype
    return pl.pallas_call(
        functools.partial(_linear_kernel, use_bf16=use_bf16),
        out_shape=jax.ShapeDtypeStruct((M, Nc), out_dtype),
        grid=(pl.cdiv(M, bm),),
        in_specs=[pl.BlockSpec((bm, K), lambda i: (i, 0)),
                  pl.BlockSpec((K, Nc), lambda i: (0, 0)),
                  pl.BlockSpec((1, Nc), lambda i: (0, 0))],
        out_specs=pl.BlockSpec((bm, Nc), lambda i: (i, 0)),
        compiler_params=pltpu.CompilerParams(dimension_semantics=("parallel",)),
    )(x, w, b.reshape(1, Nc))


def _grapher_kernel(xg_ref, xs_ref, graph_ref, bias_ref, scale_ref,
                    wg_ref, bg_ref, wps_ref, bp_ref, o_ref, *, use_bf16):
    # Block shapes:
    #   xg_ref    (BG, n, C)          grouped window tokens (bf16/f32)
    #   xs_ref    (BG, 2, H, c, N)    unfolded samples, head-major (bf16/f32)
    #   graph_ref (BG, H*n, N) int8   adjacency mask, sublane-dense layout
    #   bias_ref  (H, n, N) f32       relative position bias
    #   scale_ref (H,) f32 in SMEM    per-head logit scale
    #   wg_ref    (C, C)              full (unsplit) proj_group weight
    #   bg_ref    (1, C) f32          proj_group bias
    #   wps_ref   (H, c, C)           output projection weight split per head
    #   bp_ref    (1, C) f32          output projection bias
    BG, n, C = xg_ref.shape
    H, _, N = bias_ref.shape
    c = C // H

    mm = jnp.bfloat16 if use_bf16 else jnp.float32
    cast = lambda v: v.astype(mm)

    # (1) proj_group as ONE full-C matmul: full MXU lane utilisation, one MXU
    #     cadence instead of H narrow per-head matmuls.
    xg2 = xg_ref[...].reshape(BG * n, C)
    x1 = (jnp.dot(cast(xg2), cast(wg_ref[...]),
                  preferred_element_type=jnp.float32)
          + bg_ref[...])                                     # (BG*n, C) f32

    # f32 output-projection accumulator: lanes stay C-wide, no head concat.
    acc = jnp.zeros((BG * n, C), jnp.float32)

    # Short static head loop: everything inside is batched over the BG groups.
    for h in range(H):
        # head-h columns of x1 (static lane slice of an in-vreg value).
        x1h = x1[:, h * c:(h + 1) * c]                       # (BG*n, c)
        # F.normalize(dim=-1) via rsqrt (EUP slot, no VPU divide).
        x1h = x1h * lax.rsqrt(
            jnp.maximum(jnp.sum(x1h * x1h, axis=-1, keepdims=True), 1e-24))
        x1h = x1h.reshape(BG, n, c)

        x2 = xs_ref[:, 0, h, :, :].astype(jnp.float32)       # (BG, c, N) query half
        ft = xs_ref[:, 1, h, :, :]                           # (BG, c, N) value half
        x2n = x2 * lax.rsqrt(
            jnp.maximum(jnp.sum(x2 * x2, axis=-2, keepdims=True), 1e-24))

        # cosine similarity, batched over the window groups: (BG, n, N)
        sim = lax.dot_general(cast(x1h), cast(x2n),
                              (((2,), (1,)), ((0,), (0,))),
                              preferred_element_type=jnp.float32)

        # adjacency mask applied BEFORE the logit scale (matches the reference)
        g = graph_ref[:, pl.ds(h * n, n), :]                 # (BG, n, N) int8 {0,1}
        sim = jnp.where(g != 0, sim, sim - 100.0)

        # per-head logit scale (SMEM scalar) + relative position bias
        sim = sim * scale_ref[h] + bias_ref[h, :, :][None]

        # softmax over the sampled neighbourhood (EUP reciprocal)
        mx = jnp.max(sim, axis=-1, keepdims=True)
        p = jnp.exp(sim - mx)
        p = p * pl.reciprocal(jnp.sum(p, axis=-1, keepdims=True), approx=True)

        # value aggregation: contract over N -> (BG, n, c)
        outh = lax.dot_general(cast(p), cast(ft),
                               (((2,), (2,)), ((0,), (0,))),
                               preferred_element_type=jnp.float32)

        # output projection folded in per head (no lane-dim concatenate).
        acc = acc + jnp.dot(cast(outh.reshape(BG * n, c)), cast(wps_ref[h, :, :]),
                            preferred_element_type=jnp.float32)

    y = acc + bp_ref[...]
    o_ref[...] = y.reshape(BG, n, C).astype(o_ref.dtype)


# ----------------------------------------------------------------------------
# VMEM accounting + block-size selection
# ----------------------------------------------------------------------------
def _round_up(v, m):
    return ((v + m - 1) // m) * m


def _estimate_vmem_bytes(BG, n, C, H, c, N, act_bytes):
    """Conservative per-step VMEM estimate: double-buffered streamed blocks,
    double-buffered constant blocks, lane/sublane padding, in-kernel temps."""
    n8 = _round_up(n, 8)
    c8 = _round_up(c, 8)
    C128 = _round_up(C, 128)
    N128 = _round_up(N, 128)
    Hn32 = _round_up(H * n, 32)                    # int8 sublane tile
    # double-buffered streamed blocks
    xg = 2 * BG * n8 * C128 * act_bytes
    xs = 2 * BG * 2 * H * c8 * N128 * act_bytes
    gr = 2 * BG * Hn32 * N128 * 1
    out = 2 * BG * n8 * C128 * 4
    # double-buffered constant blocks (bias, w_group, wp_split, biases)
    consts = 2 * (H * n8 * N128 * 4
                  + _round_up(C, 8) * C128 * act_bytes
                  + H * c8 * C128 * act_bytes
                  + 2 * 8 * C128 * 4)
    # in-kernel f32 temporaries: x1 + acc, per-head sim/p, x2/x2n/ft copies
    temps = (2 * BG * n8 * C128 * 4
             + 3 * BG * n8 * N128 * 4
             + 3 * BG * c8 * N128 * 4)
    return xg + xs + gr + out + consts + int(1.25 * temps)


def _vmem_budget():
    """(physical VMEM, per-step budget, preferred minimum #grid steps)."""
    try:
        cap = int(pltpu.get_tpu_info().vmem_capacity_bytes)
    except Exception:
        cap = 64 << 20                              # conservative default
    if cap >= (100 << 20):                          # v5e / v6e: 128 MiB parts
        return cap, 48 << 20, 2
    # v7x: 64 MiB physical, 2 TensorCores -> small per-step footprint and
    # >= 4 grid steps so each core gets >= 2 (pipelined) steps.
    return cap, 18 << 20, 4


def _pick_block_groups(b_, n, C, H, c, N, act_bytes, vmem_budget, prefer_steps):
    divisors = [d for d in range(1, b_ + 1) if b_ % d == 0]
    fits = [d for d in divisors
            if _estimate_vmem_bytes(d, n, C, H, c, N, act_bytes) <= vmem_budget]
    if not fits:
        fits = [1]
    for min_steps in (prefer_steps, 2, 1):
        cand = [d for d in fits if b_ // d >= min_steps]
        if cand:
            return max(cand)
    return 1


def ipg_grapher_core(xg, xs, graph_i8, bias, scale, w_group, b_group,
                     wp_split, b_proj, *, use_bf16=True):
    b_, n, C = xg.shape
    _, _, H, c, N = xs.shape
    act_bytes = 2 if use_bf16 else 4

    cap, budget, prefer_steps = _vmem_budget()
    BG = _pick_block_groups(b_, n, C, H, c, N, act_bytes, budget, prefer_steps)
    nblk = b_ // BG
    est = _estimate_vmem_bytes(BG, n, C, H, c, N, act_bytes)
    vmem_limit = int(min(cap * 3 // 4, max(32 << 20, 2 * est)))

    kernel = functools.partial(_grapher_kernel, use_bf16=use_bf16)
    return pl.pallas_call(
        kernel,
        out_shape=jax.ShapeDtypeStruct((b_, n, C), jnp.float32),
        grid=(nblk,),
        in_specs=[
            pl.BlockSpec((BG, n, C), lambda b: (b, 0, 0)),
            pl.BlockSpec((BG, 2, H, c, N), lambda b: (b, 0, 0, 0, 0)),
            pl.BlockSpec((BG, H * n, N), lambda b: (b, 0, 0)),
            pl.BlockSpec((H, n, N), lambda b: (0, 0, 0)),
            pl.BlockSpec(memory_space=pltpu.MemorySpace.SMEM),   # per-head scale
            pl.BlockSpec((C, C), lambda b: (0, 0)),
            pl.BlockSpec((1, C), lambda b: (0, 0)),
            pl.BlockSpec((H, c, C), lambda b: (0, 0, 0)),
            pl.BlockSpec((1, C), lambda b: (0, 0)),
        ],
        out_specs=pl.BlockSpec((BG, n, C), lambda b: (b, 0, 0)),
        compiler_params=pltpu.CompilerParams(
            dimension_semantics=("parallel",),
            vmem_limit_bytes=vmem_limit),
    )(xg, xs, graph_i8, bias, scale, w_group, b_group, wp_split, b_proj)


# ----------------------------------------------------------------------------
# Full forward (glue + Pallas kernels)
# ----------------------------------------------------------------------------
def ipg_grapher_forward(params, x_complete, graph, cfg, use_bf16=True):
    gh, gw = cfg['group_size']
    kh, kw = cfg['kernel_size']
    ph, pw = cfg['padding']
    sh, sw = cfg['stride']
    H = cfg['num_heads']
    B, Hh, Ww, C = x_complete.shape
    c = C // H
    b_ = B * (Hh // gh) * (Ww // gw)
    n = gh * gw
    N = kh * kw

    act_dtype = jnp.bfloat16 if use_bf16 else x_complete.dtype

    # local_sampling(output=0): grouped windows, streamed bf16 when enabled
    xg = local_group(x_complete, gh, gw).astype(act_dtype)         # [b_, n, C]

    # proj_sample (row-tiled Pallas linear, bf16 output), then unfold to the
    # head-major sampled layout [b_, 2, H, c, N] (also bf16).
    xflat = x_complete.reshape(B * Hh * Ww, C)
    xs_proj = pallas_linear(xflat, params['w_sample'], params['b_sample'],
                            block_rows=512, use_bf16=use_bf16)
    xs_proj = xs_proj.reshape(B, Hh, Ww, 2 * C)
    xs = unfold_to_heads(xs_proj, kh, kw, ph, pw, sh, sw, H, c)    # [b_,2,H,c,N]

    # per-head logit scale (SMEM) and relative position bias
    scale = jnp.exp(jnp.minimum(params['logit_scale'], 4.6052)).reshape(H)
    bias = rel_pos_bias(params, cfg['coords_table'], cfg['rel_index'], H)

    # weights: full proj_group, head-split output projection (bf16 operands)
    w_group = params['w_group'].astype(act_dtype)                  # [C, C]
    wp_split = params['w_proj'].reshape(H, c, C).astype(act_dtype) # [H, c, C]
    b_group = params['b_group'].reshape(1, C).astype(jnp.float32)
    b_proj = params['b_proj'].reshape(1, C).astype(jnp.float32)

    # int8 graph in (b_, H*n, N) layout (sublane-dense for the int8 tile)
    graph_i8 = graph.astype(jnp.int8).reshape(b_, H * n, N)

    return ipg_grapher_core(xg, xs, graph_i8, bias, scale,
                            w_group, b_group, wp_split, b_proj,
                            use_bf16=use_bf16)


# ----------------------------------------------------------------------------
# Pure-JAX reference (for correctness check)
# ----------------------------------------------------------------------------
def reference_forward(params, x_complete, graph, cfg):
    gh, gw = cfg['group_size']
    kh, kw = cfg['kernel_size']
    ph, pw = cfg['padding']
    sh, sw = cfg['stride']
    H = cfg['num_heads']
    B, Hh, Ww, C = x_complete.shape
    c = C // H

    x = local_group(x_complete, gh, gw)                            # [b_, n, C]
    b_, n, _ = x.shape
    x1 = (x @ params['w_group'] + params['b_group']).reshape(b_, n, H, c)
    x1 = x1.transpose(0, 2, 1, 3)                                  # [b_, H, n, c]

    xs_proj = x_complete.reshape(-1, C) @ params['w_sample'] + params['b_sample']
    xs_proj = xs_proj.reshape(B, Hh, Ww, 2 * C).transpose(0, 3, 1, 2)
    xs = unfold_nchw(xs_proj, kh, kw, ph, pw, sh, sw)              # [b_, N, 2C]
    N = kh * kw
    xs = xs.reshape(b_, N, 2, H, c).transpose(2, 0, 3, 1, 4)
    x2, feat = xs[0], xs[1]                                        # [b_, H, N, c]

    def l2n(v):
        return v / jnp.maximum(jnp.linalg.norm(v, axis=-1, keepdims=True), 1e-12)

    sim = jnp.einsum('bhmc,bhnc->bhmn', l2n(x1), l2n(x2))
    sim = sim + (-100.0) * (1.0 - graph.astype(jnp.float32))
    scale = jnp.exp(jnp.minimum(params['logit_scale'], 4.6052))    # [H,1,1]
    bias = rel_pos_bias(params, cfg['coords_table'], cfg['rel_index'], H)
    sim = sim * scale[None] + bias[None]
    attn = jax.nn.softmax(sim, axis=-1)
    out = jnp.einsum('bhmn,bhnc->bhmc', attn, feat)
    out = out.transpose(0, 2, 1, 3).reshape(b_, n, C)
    return out @ params['w_proj'] + params['b_proj']


# ----------------------------------------------------------------------------
if __name__ == "__main__":
    # small config consistent with the module
    B, Hh, Ww, C = 2, 8, 8, 32
    num_heads = 2
    group_size = (4, 4)                      # window_size
    kernel_size = (8, 8)                     # unfold_dict['kernel_size'] (sample_size)
    padding = (2, 2)
    stride = (4, 4)

    gh, gw = group_size
    kh, kw = kernel_size
    b_ = B * (Hh // gh) * (Ww // gw)
    n = gh * gw
    N = kh * kw

    cfg = dict(group_size=group_size, kernel_size=kernel_size, padding=padding,
               stride=stride, num_heads=num_heads,
               coords_table=jnp.asarray(make_rel_coords_table(gh, gw, kh, kw)),
               rel_index=make_rel_pos_index(gh, gw, kh, kw))

    key = jax.random.PRNGKey(0)
    ks = jax.random.split(key, 11)
    params = {
        'logit_scale': jnp.log(10.0 * jnp.ones((num_heads, 1, 1), jnp.float32)),
        'w_group': 0.05 * jax.random.normal(ks[0], (C, C), jnp.float32),
        'b_group': 0.05 * jax.random.normal(ks[1], (C,), jnp.float32),
        'w_sample': 0.05 * jax.random.normal(ks[2], (C, 2 * C), jnp.float32),
        'b_sample': 0.05 * jax.random.normal(ks[3], (2 * C,), jnp.float32),
        'w_proj': 0.05 * jax.random.normal(ks[4], (C, C), jnp.float32),
        'b_proj': 0.05 * jax.random.normal(ks[5], (C,), jnp.float32),
        'cpb_w1': 0.05 * jax.random.normal(ks[6], (2, 512), jnp.float32),
        'cpb_b1': 0.05 * jax.random.normal(ks[7], (512,), jnp.float32),
        'cpb_w2': 0.05 * jax.random.normal(ks[8], (512, num_heads), jnp.float32),
    }

    x_complete = jax.random.normal(ks[9], (B, Hh, Ww, C), jnp.float32)
    graph = jax.random.bernoulli(ks[10], 0.7, (b_, num_heads, n, N))

    ref = reference_forward(params, x_complete, graph, cfg)

    # Production path: bf16 MXU operands + bf16 streaming (f32 accumulation).
    out_bf16 = jax.block_until_ready(
        ipg_grapher_forward(params, x_complete, graph, cfg, use_bf16=True))
    # f32 path for a tight numerical check (covers approx reciprocal / rsqrt).
    out_f32 = jax.block_until_ready(
        ipg_grapher_forward(params, x_complete, graph, cfg, use_bf16=False))

    assert out_bf16.shape == (b_, n, C), out_bf16.shape
    assert out_f32.shape == (b_, n, C), out_f32.shape
    np.testing.assert_allclose(np.asarray(out_f32), np.asarray(ref),
                               atol=5e-3, rtol=5e-3)
    np.testing.assert_allclose(np.asarray(out_bf16), np.asarray(ref),
                               atol=1e-1, rtol=1e-1)
    print("KERNEL_OK")
</pallas_src>

<mosaic_0001>
module attributes {stable_mosaic.version = 11 : i64} {
  func.func @_linear_kernel(%arg0: i32, %arg1: memref<128x32xf32, #tpu.memory_space<vmem>>, %arg2: memref<32x64xf32, #tpu.memory_space<vmem>>, %arg3: memref<1x64xf32, #tpu.memory_space<vmem>>, %arg4: memref<128x64xbf16, #tpu.memory_space<vmem>>) attributes {dimension_semantics = [#tpu.dimension_semantics<parallel>], iteration_bounds = array<i64: 1>, scalar_prefetch = 0 : i64, scratch_operands = 0 : i64, tpu.core_type = #tpu.core_type<tc>, window_params = [{transform_indices = @transform_0, window_bounds = array<i64: 128, 32>}, {pipeline_mode = #tpu.pipeline_mode<synchronous>, transform_indices = @transform_1, window_bounds = array<i64: 32, 64>}, {pipeline_mode = #tpu.pipeline_mode<synchronous>, transform_indices = @transform_2, window_bounds = array<i64: 1, 64>}, {transform_indices = @transform_3, window_bounds = array<i64: 128, 64>}]} {
    %c0 = arith.constant 0 : index
    %c0_0 = arith.constant 0 : index
    %0 = vector.load %arg1[%c0, %c0_0] : memref<128x32xf32, #tpu.memory_space<vmem>>, vector<128x32xf32>
    %1 = arith.truncf %0 : vector<128x32xf32> to vector<128x32xbf16>
    %c0_1 = arith.constant 0 : index
    %c0_2 = arith.constant 0 : index
    %2 = vector.load %arg2[%c0_1, %c0_2] : memref<32x64xf32, #tpu.memory_space<vmem>>, vector<32x64xf32>
    %3 = arith.truncf %2 : vector<32x64xf32> to vector<32x64xbf16>
    %cst = arith.constant dense<0.000000e+00> : vector<128x64xf32>
    %4 = tpu.matmul %1, %3, %cst {dimension_numbers = #tpu.dot_dimension_numbers<[1], [0], [0], [1], [0, 0, 1, 1], [], []>} : vector<128x32xbf16>, vector<32x64xbf16>, vector<128x64xf32> -> vector<128x64xf32>
    %c0_3 = arith.constant 0 : index
    %c0_4 = arith.constant 0 : index
    %5 = vector.load %arg3[%c0_3, %c0_4] : memref<1x64xf32, #tpu.memory_space<vmem>>, vector<1x64xf32>
    %6 = vector.broadcast %5 : vector<1x64xf32> to vector<128x64xf32>
    %7 = arith.addf %4, %6 : vector<128x64xf32>
    %8 = arith.truncf %7 : vector<128x64xf32> to vector<128x64xbf16>
    %c0_5 = arith.constant 0 : index
    %c0_6 = arith.constant 0 : index
    %9 = vector.load %arg4[%c0_5, %c0_6] : memref<128x64xbf16, #tpu.memory_space<vmem>>, vector<128x64xbf16>
    tpu.vector_store %arg4[%c0_5, %c0_6], %8 {strides = array<i32>} : memref<128x64xbf16, #tpu.memory_space<vmem>>, vector<128x64xbf16>,
    return
  }
  func.func @transform_0(%arg0: i32) -> (i32, i32) {
    %c0_i32 = arith.constant 0 : i32
    %c0_i32_0 = arith.constant 0 : i32
    return %arg0, %c0_i32 : i32, i32
  }
  func.func @transform_1(%arg0: i32) -> (i32, i32) {
    %c0_i32 = arith.constant 0 : i32
    %c0_i32_0 = arith.constant 0 : i32
    %c0_i32_1 = arith.constant 0 : i32
    return %c0_i32, %c0_i32_0 : i32, i32
  }
  func.func @transform_2(%arg0: i32) -> (i32, i32) {
    %c0_i32 = arith.constant 0 : i32
    %c0_i32_0 = arith.constant 0 : i32
    %c0_i32_1 = arith.constant 0 : i32
    return %c0_i32, %c0_i32_0 : i32, i32
  }
  func.func @transform_3(%arg0: i32) -> (i32, i32) {
    %c0_i32 = arith.constant 0 : i32
    %c0_i32_0 = arith.constant 0 : i32
    return %arg0, %c0_i32 : i32, i32
  }
}

</mosaic_0001>

<bundles_post_ra>
// kernel: tpu_custom_call.1
= control target key start
LH: loop header
LB: loop body
LE: loop exit
PB: predicated region body
PF: predicated region fallthrough
CT: control target
= control target key end

     0   :  { %vm52_vm0 = vcmask 261120   ;;  %vm238_vm1 = vcmask 519168   ;;  %s489_s1 = inlined_call_operand.vmem [shape: f32[32,64], index: 1, kind: input, shape index: {}]   ;;  %s490_s0 = inlined_call_operand.vmem [shape: f32[128,32], index: 0, kind: input, shape index: {}]   ;;  %s491_s2 = inlined_call_operand.vmem [shape: f32[1,64], index: 2, kind: input, shape index: {}]   ;;  %s492_s3 = inlined_call_operand.vmem [shape: bf16[128,64], index: 3, kind: output, shape index: {}]  }
   0x1   :  { %v39_v0 = vld [vmem:[%s489_s1] sm:$0xff]  ;;  %v40_v1 = vld [vmem:[%s489_s1 + $0x8] sm:$0xff]  ;;  %v41_v2 = vld [vmem:[%s489_s1 + $0x10] sm:$0xff] }
   0x2   :  { %v43_v3 = vpack.c.bf16 %v40_v1, %v39_v0  ;;  %v42_v4 = vld [vmem:[%s489_s1 + $0x18] sm:$0xff]  ;;  %v15_v5 = vld [vmem:[%s490_s0] sm:$0xff]  ;;  %v16_v6 = vld [vmem:[%s490_s0 + $0x8] sm:$0xff] }
   0x3   :  { %v44_v7 = vpack.c.bf16 %v42_v4, %v41_v2  ;;  %v31_v8 = vpack.c.bf16 %v16_v6, %v15_v5  ;;  %v23_v9 = vld [vmem:[%s490_s0 + $0x40] sm:$0xff]  ;;  %v24_v10 = vld [vmem:[%s490_s0 + $0x48] sm:$0xff]  ;;  %v17_v12 = vld [vmem:[%s490_s0 + $0x10] sm:$0xff] }
   0x4   :  { %310 = vmatprep.subr.bf16.mxu0 %v43_v3  ;;  %330 = vmatprep.subr.bf16.mxu1 %v43_v3  ;;  %v35_v11 = vpack.c.bf16 %v24_v10, %v23_v9  ;;  %v18_v13 = vld [vmem:[%s490_s0 + $0x18] sm:$0xff]  ;;  %v25_v14 = vld [vmem:[%s490_s0 + $0x50] sm:$0xff]  ;;  %v19_v16 = vld [vmem:[%s490_s0 + $0x20] sm:$0xff] }
   0x5   :  { %311 = vmatpush3.bf16.msra.mxu0 %v43_v3  ;;  %332 = vmatpush3.bf16.msra.mxu1 %v43_v3  ;;  %v26_v15 = vld [vmem:[%s490_s0 + $0x58] sm:$0xff]  ;;  %v20_v17 = vld [vmem:[%s490_s0 + $0x28] sm:$0xff]  ;;  %v27_v18 = vld [vmem:[%s490_s0 + $0x60] sm:$0xff]  ;;  %v32_v20 = vpack.c.bf16 %v18_v13, %v17_v12 }
   0x6   :  { %312 = vmatprep.subr.bf16.mxu0 %v44_v7  ;;  %331 = vmatprep.subr.bf16.mxu1 %v44_v7  ;;  %v28_v19 = vld [vmem:[%s490_s0 + $0x68] sm:$0xff]  ;;  %v36_v21 = vpack.c.bf16 %v26_v15, %v25_v14  ;;  %v33_v22 = vpack.c.bf16 %v20_v17, %v19_v16  ;;  %v21_v24 = vld [vmem:[%s490_s0 + $0x30] sm:$0xff]  ;;  %v22_v25 = vld [vmem:[%s490_s0 + $0x38] sm:$0xff] }
   0x7   :  { %314 = vmatprep.mubr.msk.bf16.mxu0 %vm52_vm0, %v31_v8  ;;  %322 = vmatprep.mubr.msk.bf16.mxu1 %vm52_vm0, %v35_v11  ;;  %v37_v23 = vpack.c.bf16 %v28_v19, %v27_v18  ;;  %v29_v26 = vld [vmem:[%s490_s0 + $0x70] sm:$0xff]  ;;  %v30_v27 = vld [vmem:[%s490_s0 + $0x78] sm:$0xff]  ;;  %v34_v28 = vpack.c.bf16 %v22_v25, %v21_v24  ;;  %v259_v30 = vld [vmem:[%s491_s2] ss:$0 sm:$0xff] }
   0x8   :  { %v38_v29 = vpack.c.bf16 %v30_v27, %v29_v26 }
   0x9   :  { %313 = vmatpush3.bf16.msra.mxu0 %v44_v7  ;;  %333 = vmatpush3.bf16.msra.mxu1 %v44_v7 }
   0xc   :  { %315 = vmatmul.mubr.msk.bf16.vlgmr.msra.gmra.mrb[0].mxu0 %vm52_vm0, %v32_v20  ;;  %323 = vmatmul.mubr.msk.bf16.vlgmr.msra.gmra.mrb[0].mxu1 %vm52_vm0, %v36_v21 }
   0xd   :  { %318 = vmatprep.mubr.msk.bf16.mxu0 %vm52_vm0, %v33_v22  ;;  %326 = vmatprep.mubr.msk.bf16.mxu1 %vm52_vm0, %v37_v23 }
  0x14   :  { %319 = vmatmul.mubr.msk.bf16.gmra.mrb[4].mxu0 %vm52_vm0, %v34_v28  ;;  %327 = vmatmul.mubr.msk.bf16.gmra.mrb[4].mxu1 %vm52_vm0, %v38_v29 }
  0xdf   :  { %v316_v31 = vpop.f32.mrb[0].mxu0  ;;  %v324_v32 = vpop.f32.mrb[0].mxu1 }
  0xe0   :  { %v120_v33 = vadd.f32 %v316_v31, %v259_v30  ;;  %v152_v34 = vadd.f32 %v324_v32, %v259_v30  ;;  %v111_v35 = vpop.f32.mrb[1].mxu0  ;;  %v143_v36 = vpop.f32.mrb[1].mxu1 }
  0xe1   :  { %v112_v37 = vadd.f32 %v259_v30, %v111_v35  ;;  %v144_v38 = vadd.f32 %v259_v30, %v143_v36  ;;  %v317_v39 = vpop.f32.mrb[2].mxu0  ;;  %v325_v40 = vpop.f32.mrb[2].mxu1 }
  0xe2   :  { %v286_v41 = vpack.c.bf16 %v120_v33, %v120_v33  ;;  %v294_v42 = vpack.c.bf16 %v152_v34, %v152_v34  ;;  %v123_v43 = vadd.f32 %v317_v39, %v259_v30  ;;  %v155_v44 = vadd.f32 %v325_v40, %v259_v30  ;;  %v114_v45 = vpop.f32.mrb[3].mxu0  ;;  %v146_v46 = vpop.f32.mrb[3].mxu1 }
  0xe3   :  { %v284_v47 = vpack.c.bf16 %v112_v37, %v112_v37  ;;  %v292_v48 = vpack.c.bf16 %v144_v38, %v144_v38  ;;  %v115_v49 = vadd.f32 %v259_v30, %v114_v45  ;;  %v147_v50 = vadd.f32 %v259_v30, %v146_v46 }
  0xe4   :  { %241 = vst.msk [vmem:[%s492_s3 + $0x8] sm:$0xf] %vm238_vm1, %v286_v41  ;;  %249 = vst.msk [vmem:[%s492_s3 + $0x28] sm:$0xf] %vm238_vm1, %v294_v42  ;;  %v287_v51 = vpack.c.bf16 %v123_v43, %v123_v43  ;;  %v295_v52 = vpack.c.bf16 %v155_v44, %v155_v44 }
  0xe5   :  { %239 = vst.msk [vmem:[%s492_s3] sm:$0xf] %vm238_vm1, %v284_v47  ;;  %247 = vst.msk [vmem:[%s492_s3 + $0x20] sm:$0xf] %vm238_vm1, %v292_v48  ;;  %v285_v53 = vpack.c.bf16 %v115_v49, %v115_v49  ;;  %v293_v54 = vpack.c.bf16 %v147_v50, %v147_v50 }
  0xe6   :  { %242 = vst.msk [vmem:[%s492_s3 + $0xc] sm:$0xf] %vm238_vm1, %v287_v51  ;;  %250 = vst.msk [vmem:[%s492_s3 + $0x2c] sm:$0xf] %vm238_vm1, %v295_v52 }
  0xe7   :  { %240 = vst.msk [vmem:[%s492_s3 + $0x4] sm:$0xf] %vm238_vm1, %v285_v53  ;;  %248 = vst.msk [vmem:[%s492_s3 + $0x24] sm:$0xf] %vm238_vm1, %v293_v54  ;;  %v320_v55 = vpop.f32.mrb[4].mxu0  ;;  %v328_v56 = vpop.f32.mrb[4].mxu1 }
  0xe8   :  { %v136_v57 = vadd.f32 %v320_v55, %v259_v30  ;;  %v168_v58 = vadd.f32 %v328_v56, %v259_v30  ;;  %v127_v59 = vpop.f32.mrb[5].mxu0  ;;  %v159_v60 = vpop.f32.mrb[5].mxu1 }
  0xe9   :  { %v128_v61 = vadd.f32 %v259_v30, %v127_v59  ;;  %v160_v62 = vadd.f32 %v259_v30, %v159_v60  ;;  %v321_v63 = vpop.f32.mrb[6].mxu0  ;;  %v329_v0 = vpop.f32.mrb[6].mxu1 }
  0xea   :  { %v290_v1 = vpack.c.bf16 %v136_v57, %v136_v57  ;;  %v298_v2 = vpack.c.bf16 %v168_v58, %v168_v58  ;;  %v139_v3 = vadd.f32 %v321_v63, %v259_v30  ;;  %v171_v4 = vadd.f32 %v329_v0, %v259_v30  ;;  %v130_v5 = vpop.f32.mrb[7].mxu0  ;;  %v162_v6 = vpop.f32.mrb[7].mxu1 }
  0xeb   :  { %v288_v7 = vpack.c.bf16 %v128_v61, %v128_v61  ;;  %v296_v8 = vpack.c.bf16 %v160_v62, %v160_v62  ;;  %v131_v9 = vadd.f32 %v259_v30, %v130_v5  ;;  %v163_v10 = vadd.f32 %v259_v30, %v162_v6 }
  0xec   :  { %245 = vst.msk [vmem:[%s492_s3 + $0x18] sm:$0xf] %vm238_vm1, %v290_v1  ;;  %253 = vst.msk [vmem:[%s492_s3 + $0x38] sm:$0xf] %vm238_vm1, %v298_v2  ;;  %v291_v11 = vpack.c.bf16 %v139_v3, %v139_v3  ;;  %v299_v12 = vpack.c.bf16 %v171_v4, %v171_v4 }
  0xed   :  { %243 = vst.msk [vmem:[%s492_s3 + $0x10] sm:$0xf] %vm238_vm1, %v288_v7  ;;  %251 = vst.msk [vmem:[%s492_s3 + $0x30] sm:$0xf] %vm238_vm1, %v296_v8  ;;  %v289_v13 = vpack.c.bf16 %v131_v9, %v131_v9  ;;  %v297_v14 = vpack.c.bf16 %v163_v10, %v163_v10 }
  0xee   :  { %246 = vst.msk [vmem:[%s492_s3 + $0x1c] sm:$0xf] %vm238_vm1, %v291_v11  ;;  %254 = vst.msk [vmem:[%s492_s3 + $0x3c] sm:$0xf] %vm238_vm1, %v299_v12 }
  0xef   :  { %244 = vst.msk [vmem:[%s492_s3 + $0x14] sm:$0xf] %vm238_vm1, %v289_v13  ;;  %252 = vst.msk [vmem:[%s492_s3 + $0x34] sm:$0xf] %vm238_vm1, %v297_v14 }

</bundles_post_ra>
